<compile_context>
chip_gen: v6e
topology: v6e:2x2x1
jax: 0.10.0
libtpu: 0.0.40
codegen_flags: <defaults>
</compile_context>

<pallas_src>
import jax
import jax.numpy as jnp
from jax.experimental import pallas as pl
from jax.experimental.pallas import tpu as pltpu

_LANE = 128
_SUB = 8


def _round_up(x, m):
    return (x + m - 1) // m * m


def _vmem_budget(need_bytes):
    # 2x margin + slack, floored at 16 MiB (safe everywhere), capped at 48 MiB
    # so it stays inside v7x's 64 MiB physical VMEM.
    return int(min(max(2 * need_bytes + (4 << 20), 16 << 20), 48 << 20))


def _reduce_kernel(x_ref, max_ref, sum_ref):
    # x_ref: (r_t, t).  max_ref / sum_ref: (r_t, 1) f32 accumulators that stay
    # resident in VMEM across the HW ("arbitrary") grid axis.
    @pl.when(pl.program_id(1) == 0)
    def _():
        max_ref[...] = jnp.zeros_like(max_ref)
        sum_ref[...] = jnp.zeros_like(sum_ref)

    x = jnp.maximum(x_ref[...], 0).astype(jnp.float32)           # ReLU
    max_ref[...] = jnp.maximum(max_ref[...], jnp.max(x, axis=-1, keepdims=True))
    sum_ref[...] = sum_ref[...] + jnp.sum(x, axis=-1, keepdims=True)


def _apply_kernel(x_ref, thr_ref, o_ref):
    # x_ref: (r_t, t)   thr_ref: (r_t, 1)   o_ref: (r_t, t)
    x = jnp.maximum(x_ref[...], 0)                               # ReLU
    thr = thr_ref[...].astype(x.dtype)                           # per-row threshold
    o_ref[...] = jnp.minimum(x, thr).astype(o_ref.dtype)


def drs_learnable(x_nchw, fc_weight):
    """x_nchw: (B, C, H, W); fc_weight: (C, C) PyTorch Linear weight (out x in)."""
    B, C, H, W = x_nchw.shape
    HW = H * W
    R = B * C
    dtype = x_nchw.dtype
    itemsize = jnp.dtype(dtype).itemsize

    # ---- tiling: lane-dense spatial tile, sublane-dense row tile ------------
    hw128 = _round_up(HW, _LANE)
    t = hw128 if hw128 <= 2048 else 512            # lane tile (multiple of 128)
    hw_pad = _round_up(HW, t)

    target_block_bytes = 1 << 20                   # ~1 MiB per x block
    r_t = (target_block_bytes // (t * itemsize)) // _SUB * _SUB
    r_t = max(_SUB, min(r_t, _round_up(R, _SUB)))  # row tile (multiple of 8)
    r_pad = _round_up(R, r_t)

    n_r = r_pad // r_t
    n_h = hw_pad // t

    # zero padding is exact here (see header comment).
    x2d = jnp.pad(x_nchw.reshape(R, HW), ((0, r_pad - R), (0, hw_pad - HW)))

    blk_bytes = r_t * t * itemsize                 # one (r_t, t) x block
    acc_bytes = r_t * _LANE * 4                    # (r_t, 1) f32, lane-padded in VMEM

    # ---- pass 1: streaming per-row max / sum --------------------------------
    reduce_vmem = 2 * blk_bytes + 2 * 2 * acc_bytes
    x_max2, x_sum2 = pl.pallas_call(
        _reduce_kernel,
        out_shape=(jax.ShapeDtypeStruct((r_pad, 1), jnp.float32),
                   jax.ShapeDtypeStruct((r_pad, 1), jnp.float32)),
        grid=(n_r, n_h),
        in_specs=[pl.BlockSpec((r_t, t), lambda r, h: (r, h))],
        out_specs=(pl.BlockSpec((r_t, 1), lambda r, h: (r, 0)),
                   pl.BlockSpec((r_t, 1), lambda r, h: (r, 0))),
        compiler_params=pltpu.CompilerParams(
            dimension_semantics=("parallel", "arbitrary"),
            vmem_limit_bytes=_vmem_budget(reduce_vmem)),
        cost_estimate=pl.CostEstimate(
            flops=2 * r_pad * hw_pad,
            transcendentals=0,
            bytes_accessed=r_pad * hw_pad * itemsize + 2 * r_pad * 4),
    )(x2d)

    # ---- fc + sigmoid (tiny, batched) in the wrapper ------------------------
    x_max = x_max2[:R, 0].reshape(B, C)
    avg = x_sum2[:R, 0].reshape(B, C) / jnp.float32(HW)          # true-HW mean
    control = jax.nn.sigmoid(
        jnp.dot(avg, fc_weight.T.astype(jnp.float32),
                preferred_element_type=jnp.float32))             # (B, C)
    thresh = (x_max * control).reshape(R, 1)                     # x_max * control
    thresh = jnp.pad(thresh, ((0, r_pad - R), (0, 0)))           # (r_pad, 1) f32

    # ---- pass 2: out = min(relu(x), x_max * control) ------------------------
    apply_vmem = 2 * 2 * blk_bytes + 2 * acc_bytes
    out2d = pl.pallas_call(
        _apply_kernel,
        out_shape=jax.ShapeDtypeStruct((r_pad, hw_pad), dtype),
        grid=(n_r, n_h),
        in_specs=[pl.BlockSpec((r_t, t), lambda r, h: (r, h)),
                  pl.BlockSpec((r_t, 1), lambda r, h: (r, 0))],
        out_specs=pl.BlockSpec((r_t, t), lambda r, h: (r, h)),
        compiler_params=pltpu.CompilerParams(
            dimension_semantics=("parallel", "parallel"),
            vmem_limit_bytes=_vmem_budget(apply_vmem)),
        cost_estimate=pl.CostEstimate(
            flops=2 * r_pad * hw_pad,
            transcendentals=0,
            bytes_accessed=2 * r_pad * hw_pad * itemsize + r_pad * 4),
    )(x2d, thresh)

    return out2d[:R, :HW].reshape(B, C, H, W)


def drs_reference(x, w):
    """Plain-JAX reference matching the PyTorch module."""
    xr = jnp.maximum(x, 0.0)
    x_max = jnp.max(xr, axis=(2, 3), keepdims=True)                 # (B,C,1,1)
    avg = jnp.mean(xr, axis=(2, 3))                                 # (B,C)
    control = jax.nn.sigmoid(avg @ w.T)[:, :, None, None]           # (B,C,1,1)
    return jnp.minimum(xr, x_max * control)


if __name__ == "__main__":
    key = jax.random.PRNGKey(0)
    k_x, k_w = jax.random.split(key)

    B, C, H, W = 2, 4, 16, 16
    x = jax.random.normal(k_x, (B, C, H, W), dtype=jnp.float32)
    # nn.Linear(channel, channel, bias=False) weight, kaiming-uniform-ish init.
    bound = 1.0 / (C ** 0.5)
    fc_w = jax.random.uniform(k_w, (C, C), dtype=jnp.float32,
                              minval=-bound, maxval=bound)

    out = jax.block_until_ready(drs_learnable(x, fc_w))

    ref = drs_reference(x, fc_w)
    assert out.shape == (B, C, H, W)
    assert jnp.allclose(out, ref, atol=1e-5, rtol=1e-5), "mismatch vs reference"

    print("KERNEL_OK")
</pallas_src>

<mosaic_0001>
module attributes {stable_mosaic.version = 11 : i64} {
  func.func @_reduce_kernel(%arg0: i32, %arg1: i32, %arg2: memref<8x256xf32, #tpu.memory_space<vmem>>, %arg3: memref<8x1xf32, #tpu.memory_space<vmem>>, %arg4: memref<8x1xf32, #tpu.memory_space<vmem>>) attributes {dimension_semantics = [#tpu.dimension_semantics<parallel>, #tpu.dimension_semantics<arbitrary>], iteration_bounds = array<i64: 1, 1>, scalar_prefetch = 0 : i64, scratch_operands = 0 : i64, tpu.core_type = #tpu.core_type<tc>, window_params = [{transform_indices = @transform_0, window_bounds = array<i64: 8, 256>}, {transform_indices = @transform_1, window_bounds = array<i64: 8, 1>}, {transform_indices = @transform_2, window_bounds = array<i64: 8, 1>}]} {
    %c0_i32 = arith.constant 0 : i32
    %0 = arith.cmpi eq, %arg1, %c0_i32 : i32
    %1 = arith.extui %0 : i1 to i32
    %c0_i32_0 = arith.constant 0 : i32
    %2 = arith.cmpi ne, %1, %c0_i32_0 : i32
    scf.if %2 {
      %cst_12 = arith.constant 0.000000e+00 : f32
      %16 = vector.broadcast %cst_12 : f32 to vector<8x1xf32>
      %c0_13 = arith.constant 0 : index
      %c0_14 = arith.constant 0 : index
      %17 = vector.load %arg3[%c0_13, %c0_14] : memref<8x1xf32, #tpu.memory_space<vmem>>, vector<8x1xf32>
      tpu.vector_store %arg3[%c0_13, %c0_14], %16 {strides = array<i32>} : memref<8x1xf32, #tpu.memory_space<vmem>>, vector<8x1xf32>,
      %cst_15 = arith.constant 0.000000e+00 : f32
      %18 = vector.broadcast %cst_15 : f32 to vector<8x1xf32>
      %c0_16 = arith.constant 0 : index
      %c0_17 = arith.constant 0 : index
      %19 = vector.load %arg4[%c0_16, %c0_17] : memref<8x1xf32, #tpu.memory_space<vmem>>, vector<8x1xf32>
      tpu.vector_store %arg4[%c0_16, %c0_17], %18 {strides = array<i32>} : memref<8x1xf32, #tpu.memory_space<vmem>>, vector<8x1xf32>,
    } else {
    }
    %c0 = arith.constant 0 : index
    %c0_1 = arith.constant 0 : index
    %3 = vector.load %arg2[%c0, %c0_1] : memref<8x256xf32, #tpu.memory_space<vmem>>, vector<8x256xf32>
    %cst = arith.constant 0.000000e+00 : f32
    %4 = vector.broadcast %cst : f32 to vector<8x256xf32>
    %5 = arith.maximumf %3, %4 : vector<8x256xf32>
    %c0_2 = arith.constant 0 : index
    %c0_3 = arith.constant 0 : index
    %6 = vector.load %arg3[%c0_2, %c0_3] : memref<8x1xf32, #tpu.memory_space<vmem>>, vector<8x1xf32>
    %cst_4 = arith.constant dense<0xFF800000> : vector<8xf32>
    %7 = vector.multi_reduction <maximumf>, %5, %cst_4 [1] : vector<8x256xf32> to vector<8xf32>
    %8 = vector.shape_cast %7 : vector<8xf32> to vector<8x1xf32>
    %9 = arith.maximumf %6, %8 : vector<8x1xf32>
    %c0_5 = arith.constant 0 : index
    %c0_6 = arith.constant 0 : index
    %10 = vector.load %arg3[%c0_5, %c0_6] : memref<8x1xf32, #tpu.memory_space<vmem>>, vector<8x1xf32>
    tpu.vector_store %arg3[%c0_5, %c0_6], %9 {strides = array<i32>} : memref<8x1xf32, #tpu.memory_space<vmem>>, vector<8x1xf32>,
    %c0_7 = arith.constant 0 : index
    %c0_8 = arith.constant 0 : index
    %11 = vector.load %arg4[%c0_7, %c0_8] : memref<8x1xf32, #tpu.memory_space<vmem>>, vector<8x1xf32>
    %cst_9 = arith.constant dense<0.000000e+00> : vector<8xf32>
    %12 = vector.multi_reduction <add>, %5, %cst_9 [1] : vector<8x256xf32> to vector<8xf32>
    %13 = vector.shape_cast %12 : vector<8xf32> to vector<8x1xf32>
    %14 = arith.addf %11, %13 : vector<8x1xf32>
    %c0_10 = arith.constant 0 : index
    %c0_11 = arith.constant 0 : index
    %15 = vector.load %arg4[%c0_10, %c0_11] : memref<8x1xf32, #tpu.memory_space<vmem>>, vector<8x1xf32>
    tpu.vector_store %arg4[%c0_10, %c0_11], %14 {strides = array<i32>} : memref<8x1xf32, #tpu.memory_space<vmem>>, vector<8x1xf32>,
    return
  }
  func.func @transform_0(%arg0: i32, %arg1: i32) -> (i32, i32) {
    %c0_i32 = arith.constant 0 : i32
    return %arg0, %arg1 : i32, i32
  }
  func.func @transform_1(%arg0: i32, %arg1: i32) -> (i32, i32) {
    %c0_i32 = arith.constant 0 : i32
    %c0_i32_0 = arith.constant 0 : i32
    return %arg0, %c0_i32 : i32, i32
  }
  func.func @transform_2(%arg0: i32, %arg1: i32) -> (i32, i32) {
    %c0_i32 = arith.constant 0 : i32
    %c0_i32_0 = arith.constant 0 : i32
    return %arg0, %c0_i32 : i32, i32
  }
}

</mosaic_0001>

<bundles_post_ra>
// kernel: tpu_custom_call.1
= control target key start
LH: loop header
LB: loop body
LE: loop exit
PB: predicated region body
PF: predicated region fallthrough
CT: control target
= control target key end

     0   :  { %8 = vsyncpa [#allocation3], 0  ;;  %s79_s9 = smov [#allocation2]   ;;  %s121_s0 = inlined_call_operand.hbm [shape: f32[8,256], index: 0, kind: input, shape index: {}]   ;;  %s122_s1 = inlined_call_operand.vmem [shape: f32[8,1], index: 1, kind: output, shape index: {0}]   ;;  %s123_s2 = inlined_call_operand.vmem [shape: f32[8,1], index: 2, kind: output, shape index: {1}]  }
   0x1   :  { %s15_s10 = sshll.u32 %s79_s9, 4  ;;  %s16_s10 = int_to_ptr.vmem [resolvable:$true] %s15_s10 }
   0x2   :  { %s65_s11 = scalar_lea.vmem %s16_s10, 256  ;;  %p70_p1 = scmp.lt.s32.totalorder %s16_s10, %s16_s10 }
   0x3   :  { %p66_p0 = scmp.ne.s32.totalorder %s16_s10, %s65_s11  ;;  %p71_p2 = scmp.lt.s32.totalorder %s65_s11, %s65_s11 }
   0x5   :  { %p72_p3 = por %p71_p2, %p70_p1 }
   0x7   :  { %p73_p4 = pnand %p72_p3, %p66_p0 }
   0x9   :  { %76 = shalt.err (!%p73_p4)
}
   0xa   :  { %18 = dma.hbm_to_vmem [thread:$0]  %s121_s0, 256, %s16_s10, [#allocation3]  }
   0xb   :  { %77 = dma.done.wait [#allocation3], 256  }
   0xc   :  { %78 = vsyncadd [#allocation3], 4294967040  ;;  %vm26_vm0 = vcmask 7168   ;;  %v80_v0 = vmov 0.0   ;;  %v29_v1 = vld [vmem:[#allocation2] sm:$0xff]  ;;  %v30_v2 = vld [vmem:[#allocation2 + $0x8] sm:$0xff] }
   0xd   :  { %27 = vst.msk [vmem:[%s122_s1] sm:$0xff] %vm26_vm0, %v80_v0  ;;  %28 = vst.msk [vmem:[%s123_s2] sm:$0xff] %vm26_vm0, %v80_v0  ;;  %v31_v3 = vmax.f32 %v29_v1, 0.0  ;;  %v32_v4 = vmax.f32 %v30_v2, 0.0 }
   0xf   :  { %v34_v5 = vmax.f32 %v31_v3, %v32_v4  ;;  %v41_v6 = vadd.f32 %v32_v4, %v31_v3 }
  0x11   :  { %35 = vmax.xlane.f32.xlu0 %v34_v5 }
  0x14   :  { %v33_v7 = vld [vmem:[%s122_s1] sm:$0xff] }
  0x15   :  { %42 = vadd.xlane.f32.xlu0 %v41_v6  ;;  %v40_v10 = vld [vmem:[%s123_s2] sm:$0xff] }
  0x9a   :  { %v36_v8 = vpop.xlane.xlu0 %35 }
  0x9b   :  { %v37_v9 = vmax.f32 %v33_v7, %v36_v8 }
  0x9d   :  { %39 = vst.msk [vmem:[%s122_s1] sm:$0xff] %vm26_vm0, %v37_v9 }
  0x9e   :  { %v43_v11 = vpop.xlane.xlu0 %42 }
  0x9f   :  { %v44_v12 = vadd.f32 %v43_v11, %v40_v10 }
  0xa1   :  { %45 = vst.msk [vmem:[%s123_s2] sm:$0xff] %vm26_vm0, %v44_v12 }
  0xa2   :  { %54 = vsyncpa [#allocation3], 1 }

</bundles_post_ra>
